<compile_context>
chip_gen: v6e
topology: v6e:2x2x1
jax: 0.10.0
libtpu: 0.0.40
codegen_flags: <defaults>
</compile_context>

<pallas_src>
import functools

import numpy as np
import jax
import jax.numpy as jnp
from jax.experimental import pallas as pl
from jax.experimental.pallas import tpu as pltpu


def _round_up(x, m):
    return (x + m - 1) // m * m


def _cdiv(a, b):
    return (a + b - 1) // b


def _vmem_budget_bytes():
    """Generation-aware VMEM budget (~half of physical, capped)."""
    try:
        info = pltpu.get_tpu_info()
        cap = getattr(info, "vmem_capacity_bytes", None) or getattr(
            info, "vmem_size_bytes", None)
        if cap:
            return int(max(32 << 20, min(cap // 2, 96 << 20)))
    except Exception:
        pass
    return 48 << 20            # conservative default (fits v5e/v6e/v7x)


def _const_spec(block_shape, index_map):
    """BlockSpec whose block never changes -> single-buffer it when supported."""
    if hasattr(pl, "Buffered"):
        try:
            return pl.BlockSpec(block_shape, index_map,
                                pipeline_mode=pl.Buffered(1))
        except TypeError:
            pass
    return pl.BlockSpec(block_shape, index_map)


# ---------------------------------------------------------------------------
# Tiling / padding plan
# ---------------------------------------------------------------------------
def plan_tiles(n_dst, n_src, *, max_dst_tile=512, max_src_tile=512,
               max_proj_tile=1024):
    # dst axis: tiles are multiples of 32 (int8 sublanes); keep >=2 even tiles
    # so v7x megacore shards the "parallel" dst axis evenly.
    t_d = _cdiv(n_dst, max_dst_tile)
    if n_dst > 64:
        t_d = max(t_d, 2)
    if t_d > 1 and t_d % 2:
        t_d += 1
    dst_tile = _round_up(_cdiv(n_dst, t_d), 32)
    n_dst_p = dst_tile * t_d

    # src axis: tiles are multiples of 128 (lane dim of the adjacency block).
    t_s = max(1, _cdiv(n_src, max_src_tile))
    src_tile = _round_up(_cdiv(n_src, t_s), 128)
    n_src_p = src_tile * t_s

    # stage-1 (projection) row tile: merge src tiles while it still divides
    # the padded size, up to max_proj_tile (stage 1 is DMA-bound; big is good).
    proj_tile = src_tile
    while proj_tile * 2 <= max_proj_tile and n_src_p % (proj_tile * 2) == 0:
        proj_tile *= 2

    return dict(dst_tile=dst_tile, n_dst_p=n_dst_p,
                src_tile=src_tile, n_src_p=n_src_p, proj_tile=proj_tile)


# ---------------------------------------------------------------------------
# Parameter / input packing (hoisted out of the hot path; do once per layer)
# ---------------------------------------------------------------------------
def pack_weights(w, film, ln_w, ln_b):
    """w: [in, out], film: [in, 2*out], ln_w/ln_b: [out]."""
    in_size, out_size = w.shape
    out_p = _round_up(out_size, 128)
    pad_c = lambda a: jnp.pad(jnp.asarray(a, jnp.float32),
                              ((0, 0), (0, out_p - a.shape[1])))
    wpack = jnp.concatenate(
        [pad_c(w), pad_c(film[:, :out_size]), pad_c(film[:, out_size:])],
        axis=1).astype(jnp.bfloat16)                        # [in, 3*out_p]
    ln_w_p = pad_c(jnp.asarray(ln_w, jnp.float32).reshape(1, out_size))
    ln_b_p = pad_c(jnp.asarray(ln_b, jnp.float32).reshape(1, out_size))
    return dict(wpack=wpack, ln_w=ln_w_p, ln_b=ln_b_p,
                in_size=in_size, out_size=out_size, out_p=out_p)


def pack_adjacency(adj, plan):
    """0/1 adjacency -> padded int8 [n_dst_p, n_src_p] (halves HBM traffic)."""
    n_dst, n_src = adj.shape
    return jnp.pad(jnp.asarray(adj).astype(jnp.int8),
                   ((0, plan["n_dst_p"] - n_dst), (0, plan["n_src_p"] - n_src)))


def pad_features(x, plan):
    n_src = x.shape[0]
    return jnp.pad(x.astype(jnp.bfloat16),
                   ((0, plan["n_src_p"] - n_src), (0, 0)))


# ---------------------------------------------------------------------------
# Stage 1: fused projection + FiLM + ReLU  (one MXU matmul per src tile).
# ---------------------------------------------------------------------------
def _film_proj_kernel(x_ref, wpack_ref, msg_ref):
    out_p = msg_ref.shape[-1]
    xw = jnp.dot(x_ref[...], wpack_ref[...], preferred_element_type=jnp.float32)
    msg = xw[:, :out_p]                    # lane-aligned slabs (out_p % 128 == 0)
    gamma = xw[:, out_p:2 * out_p]
    beta = xw[:, 2 * out_p:]
    msg_ref[...] = jnp.maximum(gamma * msg + beta, 0.0).astype(msg_ref.dtype)


# ---------------------------------------------------------------------------
# Stage 2: dense adjacency aggregation + LayerNorm epilogue.
#   grid = (dst_tiles, src_tiles); src is the reduction ("arbitrary") axis.
# ---------------------------------------------------------------------------
def _aggregate_ln_kernel(adj_ref, msg_ref, ln_w_ref, ln_b_ref, out_ref, acc_ref,
                         *, out_true, src_tile, msg_resident):
    k = pl.program_id(1)

    @pl.when(k == 0)
    def _():
        acc_ref[...] = jnp.zeros_like(acc_ref)

    adj = adj_ref[...].astype(jnp.bfloat16)          # int8 0/1 -> bf16 (exact)
    if msg_resident:
        off = pl.multiple_of(k * src_tile, 128)
        msg = msg_ref[pl.ds(off, src_tile), :]       # slice VMEM-resident msgs
    else:
        msg = msg_ref[...]
    acc_ref[...] += jnp.dot(adj, msg, preferred_element_type=jnp.float32)

    @pl.when(k == pl.num_programs(1) - 1)
    def _():
        h = acc_ref[...]
        inv_n = 1.0 / out_true                       # padded feature cols are 0
        mean = jnp.sum(h, axis=-1, keepdims=True) * inv_n
        centered = h - mean
        if out_true != h.shape[-1]:                  # mask padded cols (static)
            col = jax.lax.broadcasted_iota(jnp.int32, h.shape, 1)
            centered = jnp.where(col < out_true, centered, 0.0)
        var = jnp.sum(centered * centered, axis=-1, keepdims=True) * inv_n
        normed = centered * jax.lax.rsqrt(var + 1e-5)
        out_ref[...] = (normed * ln_w_ref[...] + ln_b_ref[...]).astype(out_ref.dtype)


# ---------------------------------------------------------------------------
# Forward
# ---------------------------------------------------------------------------
def gnn_film_forward_packed(x_p, adj_i8, params, plan, *, vmem_budget=None):
    if vmem_budget is None:
        vmem_budget = _vmem_budget_bytes()

    in_size = params["in_size"]
    out_size = params["out_size"]
    out_p = params["out_p"]
    n_src_p, n_dst_p = plan["n_src_p"], plan["n_dst_p"]
    src_tile, dst_tile, proj_tile = plan["src_tile"], plan["dst_tile"], plan["proj_tile"]

    # --- stage 1: projection + FiLM + ReLU (messages staged once, bf16) -----
    messages = pl.pallas_call(
        _film_proj_kernel,
        out_shape=jax.ShapeDtypeStruct((n_src_p, out_p), jnp.bfloat16),
        grid_spec=pltpu.PrefetchScalarGridSpec(
            num_scalar_prefetch=0,
            grid=(n_src_p // proj_tile,),
            in_specs=[
                pl.BlockSpec((proj_tile, in_size), lambda i: (i, 0)),
                _const_spec((in_size, 3 * out_p), lambda i: (0, 0)),
            ],
            out_specs=pl.BlockSpec((proj_tile, out_p), lambda i: (i, 0)),
        ),
        compiler_params=pltpu.CompilerParams(
            dimension_semantics=("parallel",),
            vmem_limit_bytes=vmem_budget),
    )(x_p, params["wpack"])

    # --- stage 2: aggregation (A @ messages) + LayerNorm ---------------------
    # Keep messages VMEM-resident (read from HBM once) when they fit the budget.
    msg_bytes = n_src_p * out_p * 2
    stage2_fixed = (2 * dst_tile * src_tile          # int8 adjacency, x2 buffers
                    + 3 * dst_tile * out_p * 4       # f32 out (x2) + accumulator
                    + (2 << 20))                     # slack
    msg_resident = (msg_bytes + stage2_fixed) <= vmem_budget
    if msg_resident:
        msg_spec = _const_spec((n_src_p, out_p), lambda i, k: (0, 0))
    else:
        msg_spec = pl.BlockSpec((src_tile, out_p), lambda i, k: (k, 0))

    out_padded = pl.pallas_call(
        functools.partial(_aggregate_ln_kernel, out_true=out_size,
                          src_tile=src_tile, msg_resident=msg_resident),
        out_shape=jax.ShapeDtypeStruct((n_dst_p, out_p), jnp.float32),
        grid_spec=pltpu.PrefetchScalarGridSpec(
            num_scalar_prefetch=0,
            grid=(n_dst_p // dst_tile, n_src_p // src_tile),
            in_specs=[
                pl.BlockSpec((dst_tile, src_tile), lambda i, k: (i, k)),
                msg_spec,
                _const_spec((1, out_p), lambda i, k: (0, 0)),
                _const_spec((1, out_p), lambda i, k: (0, 0)),
            ],
            out_specs=pl.BlockSpec((dst_tile, out_p), lambda i, k: (i, 0)),
            scratch_shapes=[pltpu.VMEM((dst_tile, out_p), jnp.float32)],
        ),
        compiler_params=pltpu.CompilerParams(
            dimension_semantics=("parallel", "arbitrary"),
            vmem_limit_bytes=vmem_budget),
    )(adj_i8, messages, params["ln_w"], params["ln_b"])

    return out_padded


def gnn_film_forward(x, w, film, adj, ln_w, ln_b):
    """Convenience wrapper: packs params/inputs (normally hoisted) and slices."""
    n_dst, n_src = adj.shape
    plan = plan_tiles(n_dst, n_src)
    params = pack_weights(w, film, ln_w, ln_b)
    x_p = pad_features(x, plan)
    adj_i8 = pack_adjacency(adj, plan)
    out_padded = gnn_film_forward_packed(x_p, adj_i8, params, plan)
    return out_padded[:n_dst, :params["out_size"]]


# ---------------------------------------------------------------------------
# References
# ---------------------------------------------------------------------------
def reference_forward_f32(x, w, film, adj, ln_w, ln_b):
    out_size = w.shape[1]
    msg = x @ w
    fw = x @ film
    gamma, beta = fw[:, :out_size], fw[:, out_size:]
    msg = jnp.maximum(gamma * msg + beta, 0.0)
    h = adj @ msg
    mean = jnp.mean(h, axis=-1, keepdims=True)
    var = jnp.mean((h - mean) ** 2, axis=-1, keepdims=True)
    return ((h - mean) / jnp.sqrt(var + 1e-5)) * ln_w.reshape(1, -1) + ln_b.reshape(1, -1)


def reference_forward_bf16(x, w, film, adj, ln_w, ln_b):
    # Mimics the kernel's mixed precision: bf16 MXU operands, f32 accumulation,
    # bf16-staged messages, two-pass LayerNorm variance.
    out_size = w.shape[1]
    xb = x.astype(jnp.bfloat16)
    msg = jnp.dot(xb, w.astype(jnp.bfloat16), preferred_element_type=jnp.float32)
    fw = jnp.dot(xb, film.astype(jnp.bfloat16), preferred_element_type=jnp.float32)
    gamma, beta = fw[:, :out_size], fw[:, out_size:]
    msg = jnp.maximum(gamma * msg + beta, 0.0).astype(jnp.bfloat16)
    h = jnp.dot(adj.astype(jnp.bfloat16), msg, preferred_element_type=jnp.float32)
    mean = jnp.mean(h, axis=-1, keepdims=True)
    var = jnp.mean((h - mean) ** 2, axis=-1, keepdims=True)
    return (h - mean) * jax.lax.rsqrt(var + 1e-5) * ln_w.reshape(1, -1) + ln_b.reshape(1, -1)


if __name__ == "__main__":
    # Small but multi-tile shapes, deliberately NOT (8,128)-aligned so the
    # wrapper's padding / planning path is exercised:
    n_src, n_dst, in_size, out_size = 384, 200, 48, 96

    key = jax.random.PRNGKey(0)
    k_x, k_w, k_f, k_a = jax.random.split(key, 4)

    x = jax.random.normal(k_x, (n_src, in_size), dtype=jnp.float32)

    # nn.Linear(in, out, bias=False) weight is [out, in]; store transposed [in, out].
    w = (jax.random.normal(k_w, (out_size, in_size), dtype=jnp.float32)
         * (1.0 / np.sqrt(in_size))).T
    film = (jax.random.normal(k_f, (2 * out_size, in_size), dtype=jnp.float32)
            * (1.0 / np.sqrt(in_size))).T

    # Random 0/1 adjacency (dst x src), playing the role of the DGL NodeFlow block.
    adj = (jax.random.uniform(k_a, (n_dst, n_src)) < 0.15).astype(jnp.float32)

    # nn.LayerNorm default init: weight = 1, bias = 0.
    ln_w = jnp.ones((out_size,), dtype=jnp.float32)
    ln_b = jnp.zeros((out_size,), dtype=jnp.float32)

    out = gnn_film_forward(x, w, film, adj, ln_w, ln_b)
    out = jax.block_until_ready(out)

    ref_bf16 = reference_forward_bf16(x, w, film, adj, ln_w, ln_b)
    np.testing.assert_allclose(np.asarray(out), np.asarray(ref_bf16),
                               rtol=2e-2, atol=2e-2)

    ref_f32 = reference_forward_f32(x, w, film, adj, ln_w, ln_b)
    np.testing.assert_allclose(np.asarray(out), np.asarray(ref_f32),
                               rtol=1e-1, atol=1e-1)

    print("KERNEL_OK")
</pallas_src>

<mosaic_0001>
module attributes {stable_mosaic.version = 11 : i64} {
  func.func @_film_proj_kernel(%arg0: i32, %arg1: memref<384x48xbf16, #tpu.memory_space<vmem>>, %arg2: memref<48x384xbf16, #tpu.memory_space<vmem>>, %arg3: memref<384x128xbf16, #tpu.memory_space<vmem>>) attributes {dimension_semantics = [#tpu.dimension_semantics<parallel>], iteration_bounds = array<i64: 1>, scalar_prefetch = 0 : i64, scratch_operands = 0 : i64, tpu.core_type = #tpu.core_type<tc>, window_params = [{transform_indices = @transform_0, window_bounds = array<i64: 384, 48>}, {pipeline_mode = #tpu.pipeline_mode<synchronous>, transform_indices = @transform_1, window_bounds = array<i64: 48, 384>}, {transform_indices = @transform_2, window_bounds = array<i64: 384, 128>}]} {
    %c0 = arith.constant 0 : index
    %c0_0 = arith.constant 0 : index
    %0 = vector.load %arg1[%c0, %c0_0] : memref<384x48xbf16, #tpu.memory_space<vmem>>, vector<384x48xbf16>
    %c0_1 = arith.constant 0 : index
    %c0_2 = arith.constant 0 : index
    %1 = vector.load %arg2[%c0_1, %c0_2] : memref<48x384xbf16, #tpu.memory_space<vmem>>, vector<48x384xbf16>
    %cst = arith.constant dense<0.000000e+00> : vector<384x384xf32>
    %2 = tpu.matmul %0, %1, %cst {dimension_numbers = #tpu.dot_dimension_numbers<[1], [0], [0], [1], [0, 0, 1, 1], [], []>} : vector<384x48xbf16>, vector<48x384xbf16>, vector<384x384xf32> -> vector<384x384xf32>
    %3 = vector.extract_strided_slice %2 {offsets = [0, 0], sizes = [384, 128], strides = [1, 1]} : vector<384x384xf32> to vector<384x128xf32>
    %4 = vector.extract_strided_slice %2 {offsets = [0, 128], sizes = [384, 128], strides = [1, 1]} : vector<384x384xf32> to vector<384x128xf32>
    %5 = vector.extract_strided_slice %2 {offsets = [0, 256], sizes = [384, 128], strides = [1, 1]} : vector<384x384xf32> to vector<384x128xf32>
    %6 = arith.mulf %4, %3 : vector<384x128xf32>
    %7 = arith.addf %6, %5 : vector<384x128xf32>
    %cst_3 = arith.constant 0.000000e+00 : f32
    %8 = vector.broadcast %cst_3 : f32 to vector<384x128xf32>
    %9 = arith.maximumf %7, %8 : vector<384x128xf32>
    %10 = arith.truncf %9 : vector<384x128xf32> to vector<384x128xbf16>
    %c0_4 = arith.constant 0 : index
    %c0_5 = arith.constant 0 : index
    %11 = vector.load %arg3[%c0_4, %c0_5] : memref<384x128xbf16, #tpu.memory_space<vmem>>, vector<384x128xbf16>
    tpu.vector_store %arg3[%c0_4, %c0_5], %10 {strides = array<i32>} : memref<384x128xbf16, #tpu.memory_space<vmem>>, vector<384x128xbf16>,
    return
  }
  func.func @transform_0(%arg0: i32) -> (i32, i32) {
    %c0_i32 = arith.constant 0 : i32
    %c0_i32_0 = arith.constant 0 : i32
    return %arg0, %c0_i32 : i32, i32
  }
  func.func @transform_1(%arg0: i32) -> (i32, i32) {
    %c0_i32 = arith.constant 0 : i32
    %c0_i32_0 = arith.constant 0 : i32
    %c0_i32_1 = arith.constant 0 : i32
    return %c0_i32, %c0_i32_0 : i32, i32
  }
  func.func @transform_2(%arg0: i32) -> (i32, i32) {
    %c0_i32 = arith.constant 0 : i32
    %c0_i32_0 = arith.constant 0 : i32
    return %arg0, %c0_i32 : i32, i32
  }
}

</mosaic_0001>

<bundles_post_ra>
// kernel: tpu_custom_call.1
= control target key start
LH: loop header
LB: loop body
LE: loop exit
PB: predicated region body
PF: predicated region fallthrough
CT: control target
= control target key end

     0   :  { %v1681_v2 = vmov 0   ;;  %vm241_vm0 = vcmask 392192   ;;  %s1984_s0 = inlined_call_operand.vmem [shape: bf16[384,48], index: 0, kind: input, shape index: {}]   ;;  %s1985_s1 = inlined_call_operand.vmem [shape: bf16[48,384], index: 1, kind: input, shape index: {}]   ;;  %s1986_s2 = inlined_call_operand.hbm [shape: bf16[384,128], index: 2, kind: output, shape index: {}]  }
   0x1   :  { %v1623_v0 = vld [vmem:[%s1985_s1 + $0x34] ss:$12 sps:$4 sm:$0xff]   ;;  %v1625_v1 = vld [vmem:[%s1985_s1 + $0x30] ss:$12 sps:$4 sm:$0xff]   ;;  %346 = vmatprep.mubr.bf16.mxu0 %v1681_v2  ;;  %526 = vmatprep.mubr.bf16.mxu1 %v1681_v2  ;;  %v1628_v4 = vld [vmem:[%s1985_s1 + $0x18] ss:$12 sps:$4 sm:$0xff]  }
   0x2   :  { %324 = vmatprep.subr.bf16.mxu0 %v1623_v0  ;;  %1613 = vmatprep.subr.bf16.mxu1 %v1623_v0  ;;  %v1626_v3 = vld [vmem:[%s1985_s1 + $0x1c] ss:$12 sps:$4 sm:$0xff]   ;;  %v1629_v5 = vld [vmem:[%s1985_s1 + $0x4] ss:$12 sps:$4 sm:$0xff]   ;;  %v1631_v6 = vld [vmem:[%s1985_s1] ss:$12 sps:$4 sm:$0xff]  }
   0x3   :  { %325 = vmatpush1.bf16.msra.mxu0 %v1625_v1  ;;  %1616 = vmatpush1.bf16.msra.mxu1 %v1625_v1  ;;  %v1634_v7 = vld [vmem:[%s1985_s1 + $0x38] ss:$12 sps:$4 sm:$0xff]   ;;  %v1729_v9 = vld [vmem:[%s1984_s0 + $0x90] sm:$0xff]   ;;  %v1639_v10 = vld [vmem:[%s1985_s1 + $0x20] ss:$12 sps:$4 sm:$0xff]  }
   0x4   :  { %326 = vmatprep.subr.bf16.mxu0 %v1626_v3  ;;  %1614 = vmatprep.subr.bf16.mxu1 %v1626_v3  ;;  %v1632_v8 = vld [vmem:[%s1984_s0] sm:$0xff]   ;;  %v1644_v11 = vld [vmem:[%s1985_s1 + $0x8] ss:$12 sps:$4 sm:$0xff]   ;;  %v1748_v13 = vld [vmem:[%s1984_s0 + $0x98] sm:$0xff]  }
   0x5   :  { %v1635_v12 = vld [vmem:[%s1984_s0 + $0x8] sm:$0xff]   ;;  %v1637_v14 = vld [vmem:[%s1984_s0 + $0x10] sm:$0xff]   ;;  %v1761_v15 = vld [vmem:[%s1984_s0 + $0xa0] sm:$0xff]  }
   0x7   :  { %327 = vmatpush1.bf16.msra.mxu0 %v1628_v4  ;;  %1617 = vmatpush1.bf16.msra.mxu1 %v1628_v4 }
   0x8   :  { %328 = vmatprep.subr.bf16.mxu0 %v1629_v5  ;;  %1615 = vmatprep.subr.bf16.mxu1 %v1629_v5 }
   0xb   :  { %329 = vmatpush1.bf16.msra.mxu0 %v1631_v6  ;;  %1618 = vmatpush1.bf16.msra.mxu1 %v1631_v6 }
   0xc   :  { %1559 = vmatprep.subr.bf16.mxu1 %v1634_v7 }
   0xe   :  { %1245 = vmatmul.mubr.msk.bf16.vlgmr.msra.gmra.mxu0 %vm241_vm0, %v1632_v8  ;;  %1263 = vmatmul.mubr.msk.bf16.vlgmr.msra.gmra.mxu1 %vm241_vm0, %v1729_v9 }
   0xf   :  { %1560 = vmatpush3.bf16.msra.mxu1 %v1634_v7  ;;  %356 = vmatprep.mubr.bf16.mxu0 %v1681_v2 }
  0x10   :  { %536 = vmatprep.mubr.bf16.mxu1 %v1681_v2  ;;  %1561 = vmatprep.subr.bf16.mxu1 %v1639_v10 }
  0x13   :  { %1562 = vmatpush3.bf16.msra.mxu1 %v1639_v10 }
  0x14   :  { %1563 = vmatprep.subr.bf16.mxu1 %v1644_v11 }
  0x16   :  { %1246 = vmatmul.mubr.msk.bf16.gmra.mxu0 %vm241_vm0, %v1635_v12  ;;  %1264 = vmatmul.mubr.msk.bf16.gmra.mxu1 %vm241_vm0, %v1748_v13 }
  0x17   :  { %366 = vmatprep.mubr.bf16.mxu0 %v1681_v2  ;;  %546 = vmatprep.mubr.bf16.mxu1 %v1681_v2 }
  0x18   :  { %1564 = vmatpush3.bf16.msra.mxu1 %v1644_v11 }
  0x1e   :  { %1247 = vmatmul.mubr.msk.bf16.gmra.mxu0 %vm241_vm0, %v1637_v14  ;;  %1265 = vmatmul.mubr.msk.bf16.gmra.mxu1 %vm241_vm0, %v1761_v15 }
  0x1f   :  { %376 = vmatprep.mubr.bf16.mxu0 %v1681_v2  ;;  %556 = vmatprep.mubr.bf16.mxu1 %v1681_v2 }
  0x20   :  { %7 = vsyncpa [#allocation3], 0  ;;  %v1640_v16 = vld [vmem:[%s1984_s0 + $0x18] sm:$0xff]   ;;  %v1774_v17 = vld [vmem:[%s1984_s0 + $0xa8] sm:$0xff]  }
  0x21   :  { %v1642_v18 = vld [vmem:[%s1984_s0 + $0x20] sm:$0xff]   ;;  %v1787_v19 = vld [vmem:[%s1984_s0 + $0xb0] sm:$0xff]   ;;  %v1645_v20 = vld [vmem:[%s1984_s0 + $0x28] sm:$0xff]  }
  0x22   :  { %v1646_v21 = vld [vmem:[%s1984_s0 + $0xb8] sm:$0xff]   ;;  %v1647_v22 = vld [vmem:[%s1984_s0 + $0x30] sm:$0xff]   ;;  %v1649_v24 = vld [vmem:[%s1984_s0 + $0x40] sm:$0xff]  }
  0x23   :  { %v1648_v23 = vld [vmem:[%s1984_s0 + $0x38] sm:$0xff]   ;;  %v1650_v25 = vld [vmem:[%s1984_s0 + $0x48] sm:$0xff]   ;;  %v1651_v26 = vld [vmem:[%s1984_s0 + $0x50] sm:$0xff]  }
  0x24   :  { %v1652_v27 = vld [vmem:[%s1984_s0 + $0x58] sm:$0xff]   ;;  %v1653_v28 = vld [vmem:[%s1984_s0 + $0x60] sm:$0xff]   ;;  %v1654_v29 = vld [vmem:[%s1984_s0 + $0x68] sm:$0xff]  }
  0x25   :  { %v1655_v30 = vld [vmem:[%s1984_s0 + $0x70] sm:$0xff]   ;;  %v1656_v31 = vld [vmem:[%s1984_s0 + $0x78] sm:$0xff]   ;;  %v1657_v32 = vld [vmem:[%s1984_s0 + $0x80] sm:$0xff]  }
  0x26   :  { %1248 = vmatmul.mubr.msk.bf16.gmra.mxu0 %vm241_vm0, %v1640_v16  ;;  %1266 = vmatmul.mubr.msk.bf16.gmra.mxu1 %vm241_vm0, %v1774_v17  ;;  %v1658_v33 = vld [vmem:[%s1984_s0 + $0x88] sm:$0xff]   ;;  %s1682_s0 = smov [#allocation2]  }
  0x27   :  { %386 = vmatprep.mubr.bf16.mxu0 %v1681_v2  ;;  %566 = vmatprep.mubr.bf16.mxu1 %v1681_v2  ;;  %s1201_s17 = sshll.u32 %s1682_s0, 4  ;;  %s1202_s17 = int_to_ptr.vmem [resolvable:$true] %s1201_s17 }
  0x28   :  { %s1659_s18 = scalar_lea.vmem %s1202_s17, 3072  ;;  %p1664_p1 = scmp.lt.s32.totalorder %s1202_s17, %s1202_s17 }
  0x29   :  { %p1660_p0 = scmp.ne.s32.totalorder %s1202_s17, %s1659_s18  ;;  %p1665_p2 = scmp.lt.s32.totalorder %s1659_s18, %s1659_s18 }
  0x2b   :  { %p1666_p3 = por %p1665_p2, %p1664_p1 }
  0x2d   :  { %p1667_p4 = pnand %p1666_p3, %p1660_p0 }
  0x2e   :  { %1249 = vmatmul.mubr.msk.bf16.gmra.mxu0 %vm241_vm0, %v1642_v18  ;;  %1267 = vmatmul.mubr.msk.bf16.gmra.mxu1 %vm241_vm0, %v1787_v19 }
  0x2f   :  { %396 = vmatprep.mubr.bf16.mxu0 %v1681_v2  ;;  %576 = vmatprep.mubr.bf16.mxu1 %v1681_v2 }
  0x36   :  { %1250 = vmatmul.mubr.msk.bf16.gmra.mxu0 %vm241_vm0, %v1645_v20  ;;  %1268 = vmatmul.mubr.msk.bf16.gmra.mxu1 %vm241_vm0, %v1646_v21 }
  0x37   :  { %406 = vmatprep.mubr.bf16.mxu0 %v1681_v2  ;;  %1565 = vmatprep.mubr.msk.bf16.mxu1 %vm241_vm0, %v1632_v8 }
  0x3e   :  { %1251 = vmatmul.mubr.msk.bf16.gmra.mxu0 %vm241_vm0, %v1647_v22  ;;  %1566 = vmatmul.mubr.msk.bf16.vlgmr.msra.gmra.mxu1 %vm241_vm0, %v1635_v12 }
  0x3f   :  { %416 = vmatprep.mubr.bf16.mxu0 %v1681_v2  ;;  %1569 = vmatprep.mubr.msk.bf16.mxu1 %vm241_vm0, %v1637_v14 }
  0x46   :  { %1252 = vmatmul.mubr.msk.bf16.gmra.mxu0 %vm241_vm0, %v1648_v23  ;;  %1570 = vmatmul.mubr.msk.bf16.gmra.mxu1 %vm241_vm0, %v1640_v16 }
  0x47   :  { %426 = vmatprep.mubr.bf16.mxu0 %v1681_v2  ;;  %1573 = vmatprep.mubr.msk.bf16.mxu1 %vm241_vm0, %v1642_v18 }
  0x4e   :  { %1253 = vmatmul.mubr.msk.bf16.gmra.mxu0 %vm241_vm0, %v1649_v24  ;;  %1574 = vmatmul.mubr.msk.bf16.gmra.mxu1 %vm241_vm0, %v1645_v20 }
  0x4f   :  { %436 = vmatprep.mubr.bf16.mxu0 %v1681_v2  ;;  %1577 = vmatprep.mubr.msk.bf16.mxu1 %vm241_vm0, %v1647_v22 }
  0x56   :  { %1254 = vmatmul.mubr.msk.bf16.gmra.mxu0 %vm241_vm0, %v1650_v25  ;;  %1578 = vmatmul.mubr.msk.bf16.gmra.mxu1 %vm241_vm0, %v1648_v23 }
  0x57   :  { %446 = vmatprep.mubr.bf16.mxu0 %v1681_v2  ;;  %1581 = vmatprep.mubr.msk.bf16.mxu1 %vm241_vm0, %v1649_v24 }
  0x5e   :  { %1255 = vmatmul.mubr.msk.bf16.gmra.mxu0 %vm241_vm0, %v1651_v26  ;;  %1582 = vmatmul.mubr.msk.bf16.gmra.mxu1 %vm241_vm0, %v1650_v25 }
  0x5f   :  { %456 = vmatprep.mubr.bf16.mxu0 %v1681_v2  ;;  %1585 = vmatprep.mubr.msk.bf16.mxu1 %vm241_vm0, %v1651_v26 }
  0x66   :  { %1256 = vmatmul.mubr.msk.bf16.gmra.mxu0 %vm241_vm0, %v1652_v27  ;;  %1586 = vmatmul.mubr.msk.bf16.gmra.mxu1 %vm241_vm0, %v1652_v27 }
  0x67   :  { %466 = vmatprep.mubr.bf16.mxu0 %v1681_v2  ;;  %1589 = vmatprep.mubr.msk.bf16.mxu1 %vm241_vm0, %v1653_v28 }
  0x6e   :  { %1257 = vmatmul.mubr.msk.bf16.gmra.mxu0 %vm241_vm0, %v1653_v28  ;;  %1590 = vmatmul.mubr.msk.bf16.gmra.mxu1 %vm241_vm0, %v1654_v29 }
  0x6f   :  { %476 = vmatprep.mubr.bf16.mxu0 %v1681_v2  ;;  %1593 = vmatprep.mubr.msk.bf16.mxu1 %vm241_vm0, %v1655_v30 }
  0x76   :  { %1258 = vmatmul.mubr.msk.bf16.gmra.mxu0 %vm241_vm0, %v1654_v29  ;;  %1594 = vmatmul.mubr.msk.bf16.gmra.mxu1 %vm241_vm0, %v1656_v31 }
  0x77   :  { %486 = vmatprep.mubr.bf16.mxu0 %v1681_v2  ;;  %1597 = vmatprep.mubr.msk.bf16.mxu1 %vm241_vm0, %v1657_v32 }
  0x7e   :  { %1259 = vmatmul.mubr.msk.bf16.gmra.mxu0 %vm241_vm0, %v1655_v30  ;;  %1598 = vmatmul.mubr.msk.bf16.gmra.mxu1 %vm241_vm0, %v1658_v33 }
  0x7f   :  { %496 = vmatprep.mubr.bf16.mxu0 %v1681_v2  ;;  %1601 = vmatprep.mubr.msk.bf16.mxu1 %vm241_vm0, %v1729_v9 }
  0x86   :  { %1260 = vmatmul.mubr.msk.bf16.gmra.mxu0 %vm241_vm0, %v1656_v31  ;;  %1602 = vmatmul.mubr.msk.bf16.gmra.mxu1 %vm241_vm0, %v1748_v13 }
  0x87   :  { %506 = vmatprep.mubr.bf16.mxu0 %v1681_v2  ;;  %1605 = vmatprep.mubr.msk.bf16.mxu1 %vm241_vm0, %v1761_v15 }
  0x8e   :  { %1261 = vmatmul.mubr.msk.bf16.gmra.mxu0 %vm241_vm0, %v1657_v32  ;;  %1606 = vmatmul.mubr.msk.bf16.gmra.mxu1 %vm241_vm0, %v1774_v17 }
  0x8f   :  { %516 = vmatprep.mubr.bf16.mxu0 %v1681_v2  ;;  %1609 = vmatprep.mubr.msk.bf16.mxu1 %vm241_vm0, %v1787_v19 }
  0x96   :  { %1262 = vmatmul.mubr.msk.bf16.gmra.mxu0 %vm241_vm0, %v1658_v33  ;;  %1610 = vmatmul.mubr.msk.bf16.gmra.mxu1 %vm241_vm0, %v1646_v21 }
  0xce   :  { %v1891_v34 = vpop.f32.mrf.mxu0  ;;  %v528_v35 = vpop.f32.mrf.mxu1 }
  0xd0   :  { %v1893_v36 = vpop.f32.mrf.mxu0  ;;  %v530_v37 = vpop.f32.mrf.mxu1 }
  0xd1   :  { %v1895_v38 = vmul.f32 %v530_v37, %v528_v35  ;;  %v812_v37 = vmul.f32 %v1893_v36, %v1891_v34 }
  0xd2   :  { %v1897_v39 = vpop.f32.mrf.mxu0  ;;  %v532_v40 = vpop.f32.mrf.mxu1 }
  0xd4   :  { %v1899_v41 = vpop.f32.mrf.mxu0  ;;  %v534_v42 = vpop.f32.mrf.mxu1 }
  0xd5   :  { %v1901_v43 = vmul.f32 %v534_v42, %v532_v40 }
  0xd6   :  { %v358_v44 = vpop.f32.mrf.mxu0  ;;  %v538_v45 = vpop.f32.mrf.mxu1 }
  0xd8   :  { %v360_v46 = vpop.f32.mrf.mxu0  ;;  %v540_v47 = vpop.f32.mrf.mxu1 }
  0xd9   :  { %v1903_v48 = vmul.f32 %v540_v47, %v538_v45  ;;  %v814_v32 = vmul.f32 %v360_v46, %v358_v44 }
  0xda   :  { %v362_v49 = vpop.f32.mrf.mxu0  ;;  %v542_v50 = vpop.f32.mrf.mxu1 }
  0xdc   :  { %v364_v51 = vpop.f32.mrf.mxu0  ;;  %v544_v52 = vpop.f32.mrf.mxu1 }
  0xdd   :  { %v1905_v53 = vmul.f32 %v544_v52, %v542_v50  ;;  %v815_v40 = vmul.f32 %v364_v51, %v362_v49  ;;  %v813_v50 = vmul.f32 %v1899_v41, %v1897_v39 }
  0xde   :  { %v1907_v54 = vpop.f32.mrf.mxu0  ;;  %v548_v55 = vpop.f32.mrf.mxu1 }
  0xe0   :  { %v1909_v56 = vpop.f32.mrf.mxu0  ;;  %v550_v57 = vpop.f32.mrf.mxu1 }
  0xe1   :  { %v1911_v58 = vmul.f32 %v550_v57, %v548_v55 }
  0xe2   :  { %v1913_v59 = vpop.f32.mrf.mxu0  ;;  %v552_v60 = vpop.f32.mrf.mxu1 }
  0xe4   :  { %v1915_v61 = vpop.f32.mrf.mxu0  ;;  %v554_v62 = vpop.f32.mrf.mxu1 }
  0xe5   :  { %v1917_v63 = vmul.f32 %v554_v62, %v552_v60 }
  0xe6   :  { %v378_v0 = vpop.f32.mrf.mxu0  ;;  %v558_v1 = vpop.f32.mrf.mxu1 }
  0xe8   :  { %v380_v2 = vpop.f32.mrf.mxu0  ;;  %v560_v3 = vpop.f32.mrf.mxu1 }
  0xe9   :  { %v1919_v4 = vmul.f32 %v560_v3, %v558_v1 }
  0xea   :  { %v382_v5 = vpop.f32.mrf.mxu0  ;;  %v562_v6 = vpop.f32.mrf.mxu1 }
  0xec   :  { %v384_v7 = vpop.f32.mrf.mxu0  ;;  %v564_v8 = vpop.f32.mrf.mxu1 }
  0xed   :  { %v1921_v9 = vmul.f32 %v564_v8, %v562_v6  ;;  %v818_v6 = vmul.f32 %v380_v2, %v378_v0  ;;  %v819_v39 = vmul.f32 %v384_v7, %v382_v5 }
  0xee   :  { %v1923_v10 = vpop.f32.mrf.mxu0  ;;  %v568_v11 = vpop.f32.mrf.mxu1 }
  0xf0   :  { %v1925_v12 = vpop.f32.mrf.mxu0  ;;  %v570_v13 = vpop.f32.mrf.mxu1 }
  0xf1   :  { %v1927_v14 = vmul.f32 %v570_v13, %v568_v11  ;;  %v816_v11 = vmul.f32 %v1909_v56, %v1907_v54 }
  0xf2   :  { %v1929_v15 = vpop.f32.mrf.mxu0  ;;  %v572_v16 = vpop.f32.mrf.mxu1 }
  0xf4   :  { %v1931_v17 = vpop.f32.mrf.mxu0  ;;  %v574_v18 = vpop.f32.mrf.mxu1 }
  0xf5   :  { %v1933_v19 = vmul.f32 %v574_v18, %v572_v16 }
  0xf6   :  { %v398_v20 = vpop.f32.mrf.mxu0  ;;  %v578_v21 = vpop.f32.mrf.mxu1 }
  0xf8   :  { %v400_v22 = vpop.f32.mrf.mxu0  ;;  %v580_v23 = vpop.f32.mrf.mxu1 }
  0xf9   :  { %v1935_v24 = vmul.f32 %v580_v23, %v578_v21  ;;  %v817_v21 = vmul.f32 %v1915_v61, %v1913_v59  ;;  %v822_v54 = vmul.f32 %v400_v22, %v398_v20 }
  0xfa   :  { %v402_v25 = vpop.f32.mrf.mxu0  ;;  %v582_v26 = vpop.f32.mrf.mxu1 }
  0xfc   :  { %v404_v27 = vpop.f32.mrf.mxu0  ;;  %v584_v28 = vpop.f32.mrf.mxu1 }
  0xfd   :  { %v1937_v29 = vmul.f32 %v584_v28, %v582_v26  ;;  %v823_v59 = vmul.f32 %v404_v27, %v402_v25 }
  0xfe   :  { %v1939_v30 = vpop.f32.mrf.mxu0  ;;  %v1567_v31 = vpop.f32.mrf.mxu1 }
  0xff   :  { %v862_v42 = vadd.f32 %v1567_v31, %v814_v32 }
 0x100   :  { %v1941_v33 = vpop.f32.mrf.mxu0  ;;  %v621_v35 = vpop.f32.mrf.mxu1 }
 0x101   :  { %v860_v52 = vadd.f32 %v812_v37, %v621_v35  ;;  %v910_v44 = vmax.f32 %v862_v42, 0.0 }
 0x102   :  { %v1945_v45 = vpop.f32.mrf.mxu0  ;;  %v1568_v47 = vpop.f32.mrf.mxu1 }
 0x103   :  { %v863_v55 = vadd.f32 %v1568_v47, %v815_v40  ;;  %v908_v34 = vmax.f32 %v860_v52, 0.0  ;;  %v820_v47 = vmul.f32 %v1925_v12, %v1923_v10 }
 0x104   :  { %v1949_v57 = vpop.f32.mrf.mxu0  ;;  %v624_v60 = vpop.f32.mrf.mxu1 }
 0x105   :  { %v911_v46 = vmax.f32 %v863_v55, 0.0  ;;  %v861_v62 = vadd.f32 %v813_v50, %v624_v60  ;;  %v821_v60 = vmul.f32 %v1931_v17, %v1929_v15 }
 0x106   :  { %v418_v1 = vpop.f32.mrf.mxu0  ;;  %v1571_v3 = vpop.f32.mrf.mxu1 }
 0x107   :  { %v1397_v36 = vpack.c.bf16 %v911_v46, %v910_v44  ;;  %v909_v49 = vmax.f32 %v861_v62, 0.0  ;;  %v866_v13 = vadd.f32 %v1571_v3, %v818_v6 }
 0x108   :  { %v420_v51 = vpop.f32.mrf.mxu0  ;;  %v637_v8 = vpop.f32.mrf.mxu1 }
 0x109   :  { %1509 = vst [vmem:[#allocation2 + $0x8] sm:$0xff] %v1397_v36   ;;  %v1392_v41 = vpack.c.bf16 %v909_v49, %v908_v34  ;;  %v864_v23 = vadd.f32 %v816_v11, %v637_v8  ;;  %v914_v28 = vmax.f32 %v866_v13, 0.0  ;;  %v826_v10 = vmul.f32 %v420_v51, %v418_v1 }
 0x10a   :  { %v422_v16 = vpop.f32.mrf.mxu0  ;;  %v1572_v18 = vpop.f32.mrf.mxu1  ;;  %v824_v11 = vmul.f32 %v1941_v33, %v1939_v30 }
 0x10b   :  { %1393 = vst [vmem:[#allocation2] sm:$0xff] %v1392_v41   ;;  %v867_v0 = vadd.f32 %v1572_v18, %v819_v39  ;;  %v912_v56 = vmax.f32 %v864_v23, 0.0  ;;  %v825_v18 = vmul.f32 %v1949_v57, %v1945_v45 }
 0x10c   :  { %v424_v2 = vpop.f32.mrf.mxu0  ;;  %v640_v26 = vpop.f32.mrf.mxu1 }
 0x10d   :  { %v915_v31 = vmax.f32 %v867_v0, 0.0  ;;  %v865_v32 = vadd.f32 %v817_v21, %v640_v26  ;;  %v827_v15 = vmul.f32 %v424_v2, %v422_v16 }
 0x10e   :  { %v428_v35 = vpop.f32.mrf.mxu0  ;;  %v1575_v37 = vpop.f32.mrf.mxu1 }
 0x10f   :  { %v1407_v5 = vpack.c.bf16 %v915_v31, %v914_v28  ;;  %v913_v7 = vmax.f32 %v865_v32, 0.0  ;;  %v870_v50 = vadd.f32 %v1575_v37, %v822_v54 }
 0x110   :  { %v430_v40 = vpop.f32.mrf.mxu0  ;;  %v653_v42 = vpop.f32.mrf.mxu1 }
 0x111   :  { %1511 = vst [vmem:[#allocation2 + $0x18] sm:$0xff] %v1407_v5   ;;  %v1402_v61 = vpack.c.bf16 %v913_v7, %v912_v56  ;;  %v868_v44 = vadd.f32 %v820_v47, %v653_v42  ;;  %v918_v62 = vmax.f32 %v870_v50, 0.0  ;;  %v828_v56 = vmul.f32 %v430_v40, %v428_v35 }
 0x112   :  { %v432_v52 = vpop.f32.mrf.mxu0  ;;  %v1576_v55 = vpop.f32.mrf.mxu1 }
 0x113   :  { %1510 = vst [vmem:[#allocation2 + $0x10] sm:$0xff] %v1402_v61   ;;  %v871_v20 = vadd.f32 %v1576_v55, %v823_v59  ;;  %v916_v12 = vmax.f32 %v868_v44, 0.0 }
 0x114   :  { %v434_v22 = vpop.f32.mrf.mxu0  ;;  %v656_v46 = vpop.f32.mrf.mxu1 }
 0x115   :  { %v919_v3 = vmax.f32 %v871_v20, 0.0  ;;  %v869_v6 = vadd.f32 %v821_v60, %v656_v46  ;;  %v829_v47 = vmul.f32 %v434_v22, %v432_v52 }
 0x116   :  { %v438_v34 = vpop.f32.mrf.mxu0  ;;  %v1579_v36 = vpop.f32.mrf.mxu1 }
 0x117   :  { %v1417_v25 = vpack.c.bf16 %v919_v3, %v918_v62  ;;  %v917_v27 = vmax.f32 %v869_v6, 0.0  ;;  %v874_v39 = vadd.f32 %v1579_v36, %v826_v10 }
 0x118   :  { %v440_v49 = vpop.f32.mrf.mxu0  ;;  %v669_v8 = vpop.f32.mrf.mxu1 }
 0x119   :  { %1513 = vst [vmem:[#allocation2 + $0x28] sm:$0xff] %v1417_v25   ;;  %v1412_v17 = vpack.c.bf16 %v917_v27, %v916_v12  ;;  %v872_v21 = vadd.f32 %v824_v11, %v669_v8  ;;  %v922_v0 = vmax.f32 %v874_v39, 0.0  ;;  %v830_v30 = vmul.f32 %v440_v49, %v438_v34 }
 0x11a   :  { %v442_v41 = vpop.f32.mrf.mxu0  ;;  %v1580_v13 = vpop.f32.mrf.mxu1 }
 0x11b   :  { %1512 = vst [vmem:[#allocation2 + $0x20] sm:$0xff] %v1412_v17   ;;  %v875_v1 = vadd.f32 %v1580_v13, %v827_v15  ;;  %v920_v33 = vmax.f32 %v872_v21, 0.0 }
 0x11c   :  { %v444_v51 = vpop.f32.mrf.mxu0  ;;  %v672_v23 = vpop.f32.mrf.mxu1 }
 0x11d   :  { %v923_v26 = vmax.f32 %v875_v1, 0.0  ;;  %v873_v28 = vadd.f32 %v825_v18, %v672_v23  ;;  %v831_v5 = vmul.f32 %v444_v51, %v442_v41 }
 0x11e   :  { %v448_v31 = vpop.f32.mrf.mxu0  ;;  %v1583_v32 = vpop.f32.mrf.mxu1 }
 0x11f   :  { %v1427_v16 = vpack.c.bf16 %v923_v26, %v922_v0  ;;  %v921_v2 = vmax.f32 %v873_v28, 0.0  ;;  %v878_v57 = vadd.f32 %v1583_v32, %v830_v30 }
 0x120   :  { %v450_v37 = vpop.f32.mrf.mxu0  ;;  %v685_v54 = vpop.f32.mrf.mxu1 }
 0x121   :  { %1515 = vst [vmem:[#allocation2 + $0x38] sm:$0xff] %v1427_v16   ;;  %v1422_v45 = vpack.c.bf16 %v921_v2, %v920_v33  ;;  %v876_v59 = vadd.f32 %v828_v56, %v685_v54  ;;  %v926_v60 = vmax.f32 %v878_v57, 0.0  ;;  %v832_v36 = vmul.f32 %v450_v37, %v448_v31 }
 0x122   :  { %v452_v7 = vpop.f32.mrf.mxu0  ;;  %v1584_v42 = vpop.f32.mrf.mxu1 }
 0x123   :  { %1514 = vst [vmem:[#allocation2 + $0x30] sm:$0xff] %v1422_v45   ;;  %v879_v61 = vadd.f32 %v1584_v42, %v831_v5  ;;  %v924_v3 = vmax.f32 %v876_v59, 0.0 }
 0x124   :  { %v454_v50 = vpop.f32.mrf.mxu0  ;;  %v688_v55 = vpop.f32.mrf.mxu1 }
 0x125   :  { %v927_v44 = vmax.f32 %v879_v61, 0.0  ;;  %v877_v20 = vadd.f32 %v829_v47, %v688_v55  ;;  %v833_v25 = vmul.f32 %v454_v50, %v452_v7 }
 0x126   :  { %v458_v46 = vpop.f32.mrf.mxu0  ;;  %v1587_v62 = vpop.f32.mrf.mxu1 }
 0x127   :  { %v1437_v6 = vpack.c.bf16 %v927_v44, %v926_v60  ;;  %v925_v35 = vmax.f32 %v877_v20, 0.0 }
 0x128   :  { %v460_v40 = vpop.f32.mrf.mxu0  ;;  %v701_v34 = vpop.f32.mrf.mxu1 }
 0x129   :  { %1517 = vst [vmem:[#allocation2 + $0x48] sm:$0xff] %v1437_v6   ;;  %v1432_v10 = vpack.c.bf16 %v925_v35, %v924_v3  ;;  %v834_v12 = vmul.f32 %v460_v40, %v458_v46  ;;  %v880_v27 = vadd.f32 %v832_v36, %v701_v34 }
 0x12a   :  { %v462_v52 = vpop.f32.mrf.mxu0  ;;  %v1588_v22 = vpop.f32.mrf.mxu1 }
 0x12b   :  { %1516 = vst [vmem:[#allocation2 + $0x40] sm:$0xff] %v1432_v10   ;;  %v882_v11 = vadd.f32 %v1587_v62, %v834_v12  ;;  %v928_v13 = vmax.f32 %v880_v27, 0.0 }
 0x12c   :  { %v464_v49 = vpop.f32.mrf.mxu0  ;;  %v704_v8 = vpop.f32.mrf.mxu1 }
 0x12d   :  { %v835_v15 = vmul.f32 %v464_v49, %v462_v52  ;;  %v881_v17 = vadd.f32 %v833_v25, %v704_v8  ;;  %v930_v23 = vmax.f32 %v882_v11, 0.0 }
 0x12e   :  { %v468_v39 = vpop.f32.mrf.mxu0  ;;  %v1591_v41 = vpop.f32.mrf.mxu1 }
 0x12f   :  { %v883_v18 = vadd.f32 %v1588_v22, %v835_v15  ;;  %v929_v21 = vmax.f32 %v881_v17, 0.0 }
 0x130   :  { %v470_v1 = vpop.f32.mrf.mxu0  ;;  %v717_v51 = vpop.f32.mrf.mxu1 }
 0x131   :  { %v931_v0 = vmax.f32 %v883_v18, 0.0  ;;  %v1442_v26 = vpack.c.bf16 %v929_v21, %v928_v13  ;;  %v836_v28 = vmul.f32 %v470_v1, %v468_v39 }
 0x132   :  { %v472_v31 = vpop.f32.mrf.mxu0  ;;  %v1592_v32 = vpop.f32.mrf.mxu1 }
 0x133   :  { %v1447_v30 = vpack.c.bf16 %v931_v0, %v930_v23  ;;  %1518 = vst [vmem:[#allocation2 + $0x50] sm:$0xff] %v1442_v26   ;;  %v884_v2 = vadd.f32 %v836_v28, %v717_v51 }
 0x134   :  { %v474_v33 = vpop.f32.mrf.mxu0  ;;  %v720_v16 = vpop.f32.mrf.mxu1 }
 0x135   :  { %1519 = vst [vmem:[#allocation2 + $0x58] sm:$0xff] %v1447_v30   ;;  %v837_v37 = vmul.f32 %v474_v33, %v472_v31  ;;  %v932_v7 = vmax.f32 %v884_v2, 0.0 }
 0x136   :  { %v478_v54 = vpop.f32.mrf.mxu0  ;;  %v1595_v56 = vpop.f32.mrf.mxu1 }
 0x137   :  { %v885_v5 = vadd.f32 %v837_v37, %v720_v16 }
 0x138   :  { %v480_v45 = vpop.f32.mrf.mxu0  ;;  %v733_v57 = vpop.f32.mrf.mxu1 }
 0x139   :  { %v933_v42 = vmax.f32 %v885_v5, 0.0  ;;  %v838_v47 = vmul.f32 %v480_v45, %v478_v54 }
 0x13a   :  { %v482_v59 = vpop.f32.mrf.mxu0  ;;  %v1596_v61 = vpop.f32.mrf.mxu1 }
 0x13b   :  { %v1452_v50 = vpack.c.bf16 %v933_v42, %v932_v7  ;;  %v886_v44 = vadd.f32 %v1591_v41, %v838_v47 }
 0x13c   :  { %v484_v55 = vpop.f32.mrf.mxu0  ;;  %v736_v60 = vpop.f32.mrf.mxu1 }
 0x13d   :  { %1520 = vst [vmem:[#allocation2 + $0x60] sm:$0xff] %v1452_v50   ;;  %v839_v20 = vmul.f32 %v484_v55, %v482_v59  ;;  %v934_v40 = vmax.f32 %v886_v44, 0.0 }
 0x13e   :  { %v488_v46 = vpop.f32.mrf.mxu0  ;;  %v1963_v62 = vpop.f32.mrf.mxu1 }
 0x13f   :  { %v887_v3 = vadd.f32 %v1592_v32, %v839_v20 }
 0x140   :  { %v490_v6 = vpop.f32.mrf.mxu0  ;;  %v749_v35 = vpop.f32.mrf.mxu1 }
 0x141   :  { %v935_v34 = vmax.f32 %v887_v3, 0.0  ;;  %v840_v36 = vmul.f32 %v490_v6, %v488_v46 }
 0x142   :  { %v492_v10 = vpop.f32.mrf.mxu0  ;;  %v1965_v12 = vpop.f32.mrf.mxu1 }
 0x143   :  { %v1457_v52 = vpack.c.bf16 %v935_v34, %v934_v40  ;;  %v888_v27 = vadd.f32 %v840_v36, %v733_v57 }
 0x144   :  { %v494_v22 = vpop.f32.mrf.mxu0  ;;  %v752_v25 = vpop.f32.mrf.mxu1 }
 0x145   :  { %1521 = vst [vmem:[#allocation2 + $0x68] sm:$0xff] %v1457_v52   ;;  %v841_v49 = vmul.f32 %v494_v22, %v492_v10  ;;  %v936_v13 = vmax.f32 %v888_v27, 0.0 }
 0x146   :  { %v498_v8 = vpop.f32.mrf.mxu0  ;;  %v1603_v11 = vpop.f32.mrf.mxu1 }
 0x147   :  { %v889_v15 = vadd.f32 %v841_v49, %v736_v60  ;;  %v898_v17 = vadd.f32 %v1603_v11, %v1903_v48 }
 0x148   :  { %v500_v39 = vpop.f32.mrf.mxu0  ;;  %v765_v41 = vpop.f32.mrf.mxu1 }
 0x149   :  { %v937_v18 = vmax.f32 %v889_v15, 0.0  ;;  %v842_v21 = vmul.f32 %v500_v39, %v498_v8  ;;  %v896_v0 = vadd.f32 %v1895_v38, %v765_v41  ;;  %v946_v28 = vmax.f32 %v898_v17, 0.0 }
 0x14a   :  { %v502_v1 = vpop.f32.mrf.mxu0  ;;  %v1604_v51 = vpop.f32.mrf.mxu1 }
 0x14b   :  { %v1462_v23 = vpack.c.bf16 %v937_v18, %v936_v13  ;;  %v899_v26 = vadd.f32 %v1604_v51, %v1905_v53  ;;  %v890_v30 = vadd.f32 %v1595_v56, %v842_v21  ;;  %v944_v54 = vmax.f32 %v896_v0, 0.0 }
 0x14c   :  { %v504_v31 = vpop.f32.mrf.mxu0  ;;  %v768_v32 = vpop.f32.mrf.mxu1 }
 0x14d   :  { %1522 = vst [vmem:[#allocation2 + $0x70] sm:$0xff] %v1462_v23   ;;  %v947_v33 = vmax.f32 %v899_v26, 0.0  ;;  %v843_v16 = vmul.f32 %v504_v31, %v502_v1  ;;  %v897_v48 = vadd.f32 %v1901_v43, %v768_v32  ;;  %v938_v53 = vmax.f32 %v890_v30, 0.0 }
 0x14e   :  { %v508_v2 = vpop.f32.mrf.mxu0  ;;  %v1607_v37 = vpop.f32.mrf.mxu1 }
 0x14f   :  { %v1487_v5 = vpack.c.bf16 %v947_v33, %v946_v28  ;;  %v891_v45 = vadd.f32 %v1596_v61, %v843_v16  ;;  %v945_v57 = vmax.f32 %v897_v48, 0.0  ;;  %v902_v7 = vadd.f32 %v1607_v37, %v1919_v4 }
 0x150   :  { %v510_v38 = vpop.f32.mrf.mxu0  ;;  %v781_v42 = vpop.f32.mrf.mxu1 }
 0x151   :  { %1527 = vst [vmem:[#allocation2 + $0x98] sm:$0xff] %v1487_v5   ;;  %v939_v47 = vmax.f32 %v891_v45, 0.0  ;;  %v1482_v59 = vpack.c.bf16 %v945_v57, %v944_v54  ;;  %v844_v50 = vmul.f32 %v510_v38, %v508_v2  ;;  %v900_v43 = vadd.f32 %v1911_v58, %v781_v42 }
 0x152   :  { %v512_v56 = vpop.f32.mrf.mxu0  ;;  %v1608_v55 = vpop.f32.mrf.mxu1  ;;  %v950_v20 = vmax.f32 %v902_v7, 0.0 }
 0x153   :  { %v1467_v60 = vpack.c.bf16 %v939_v47, %v938_v53  ;;  %1526 = vst [vmem:[#allocation2 + $0x90] sm:$0xff] %v1482_v59   ;;  %v903_v44 = vadd.f32 %v1608_v55, %v1921_v9  ;;  %v892_v4 = vadd.f32 %v844_v50, %v749_v35  ;;  %v948_v10 = vmax.f32 %v900_v43, 0.0 }
 0x154   :  { %v514_v61 = vpop.f32.mrf.mxu0  ;;  %v784_v46 = vpop.f32.mrf.mxu1 }
 0x155   :  { %1523 = vst [vmem:[#allocation2 + $0x78] sm:$0xff] %v1467_v60   ;;  %v951_v3 = vmax.f32 %v903_v44, 0.0  ;;  %v845_v6 = vmul.f32 %v514_v61, %v512_v56  ;;  %v901_v40 = vadd.f32 %v1917_v63, %v784_v46  ;;  %v940_v9 = vmax.f32 %v892_v4, 0.0 }
 0x156   :  { %v518_v34 = vpop.f32.mrf.mxu0  ;;  %v1611_v36 = vpop.f32.mrf.mxu1 }
 0x157   :  { %v1497_v52 = vpack.c.bf16 %v951_v3, %v950_v20  ;;  %v893_v22 = vadd.f32 %v845_v6, %v752_v25  ;;  %v949_v27 = vmax.f32 %v901_v40, 0.0  ;;  %v906_v49 = vadd.f32 %v1611_v36, %v1935_v24 }
 0x158   :  { %v520_v58 = vpop.f32.mrf.mxu0  ;;  %v797_v8 = vpop.f32.mrf.mxu1 }
 0x159   :  { %1529 = vst [vmem:[#allocation2 + $0xa8] sm:$0xff] %v1497_v52   ;;  %v941_v11 = vmax.f32 %v893_v22, 0.0  ;;  %v1492_v15 = vpack.c.bf16 %v949_v27, %v948_v10  ;;  %v846_v17 = vmul.f32 %v520_v58, %v518_v34  ;;  %v904_v63 = vadd.f32 %v1927_v14, %v797_v8 }
 0x15a   :  { %v522_v35 = vpop.f32.mrf.mxu0  ;;  %v1612_v39 = vpop.f32.mrf.mxu1  ;;  %v954_v18 = vmax.f32 %v906_v49, 0.0 }
 0x15b   :  { %v1472_v41 = vpack.c.bf16 %v941_v11, %v940_v9  ;;  %1528 = vst [vmem:[#allocation2 + $0xa0] sm:$0xff] %v1492_v15   ;;  %v907_v13 = vadd.f32 %v1612_v39, %v1937_v29  ;;  %v894_v24 = vadd.f32 %v1963_v62, %v846_v17  ;;  %v952_v0 = vmax.f32 %v904_v63, 0.0 }
 0x15c   :  { %v524_v25 = vpop.f32.mrf.mxu0  ;;  %v800_v21 = vpop.f32.mrf.mxu1 }
 0x15d   :  { %1524 = vst [vmem:[#allocation2 + $0x80] sm:$0xff] %v1472_v41   ;;  %v955_v1 = vmax.f32 %v907_v13, 0.0  ;;  %v847_v51 = vmul.f32 %v524_v25, %v522_v35  ;;  %v905_v23 = vadd.f32 %v1933_v19, %v800_v21  ;;  %v942_v14 = vmax.f32 %v894_v24, 0.0 }
 0x15f   :  { %v1507_v26 = vpack.c.bf16 %v955_v1, %v954_v18  ;;  %v895_v28 = vadd.f32 %v1965_v12, %v847_v51  ;;  %v953_v31 = vmax.f32 %v905_v23, 0.0 }
 0x161   :  { %1531 = vst [vmem:[#allocation2 + $0xb8] sm:$0xff] %v1507_v26   ;;  %v943_v29 = vmax.f32 %v895_v28, 0.0  ;;  %v1502_v32 = vpack.c.bf16 %v953_v31, %v952_v0 }
 0x163   :  { %v1477_v30 = vpack.c.bf16 %v943_v29, %v942_v14  ;;  %1530 = vst [vmem:[#allocation2 + $0xb0] sm:$0xff] %v1502_v32  }
 0x165   :  { %1525 = vst [vmem:[#allocation2 + $0x88] sm:$0xff] %v1477_v30  }
 0x166   :  { %1670 = shalt.err (!%p1667_p4)
}
 0x167   :  { %s1683_s19 = smov 64   ;;  %s1684_s20 = smov 4  }
 0x168   :  { %1207 = dma.vmem_to_hbm [thread:$0]  %s1202_s17, 3072, %s1986_s2, [#allocation3], %s1683_s19, %s1683_s19, %s1684_s20  }
 0x169   :  { %1679 = dma.done.wait [#allocation3], 3072  }
 0x16a   :  { %1680 = vsyncadd [#allocation3], 4294964224 }
 0x16b   :  { %1211 = vsyncpa [#allocation3], 1 }

</bundles_post_ra>
